<compile_context>
chip_gen: v7x
topology: tpu7x:2x2x1
jax: 0.10.0
libtpu: 0.0.40
codegen_flags: <defaults>
</compile_context>

<pallas_src>
import jax
import jax.numpy as jnp
from jax.experimental import pallas as pl
from jax.experimental.pallas import tpu as pltpu

# ---- small synthetic sizes (real model: D=512, n_mels=80, vocab=38 phones) ----
B = 2            # batch
T = 8            # phoneme sequence length
BT = B * T       # flattened batch*time rows
VOCAB = 38       # phoneme vocabulary size
D = 32           # embedding / encoder channels
KW = 5           # conv kernel width (Tacotron2 encoder uses 5)
PAD = (KW - 1) // 2
N_LAYERS = 3     # Tacotron2 encoder has 3 conv layers
N_MELS = 8       # mel channels (stand-in for 80)
OUT_PAD = 128    # lane-dense padded output width (slice to N_MELS in wrapper)


def _im2col(h):
    """h: (B*T, D) f32 -> (B*T, KW*D) bf16 tap slab with per-batch 'same' padding.

    Pure value-level construction (no VMEM scratch round-trip): pad each batch
    element's (T, D) block with zero rows, concatenate the KW shifted views
    along the lane axis, then stack the batch elements back along sublanes.
    """
    zrow = jnp.zeros((PAD, D), jnp.float32)
    slabs = []
    for b in range(B):                              # B=2, unrolled, static slices
        hb = h[b * T:(b + 1) * T, :]                # (T, D)
        hp = jnp.concatenate([zrow, hb, zrow], axis=0)      # (T+KW-1, D)
        slabs.append(jnp.concatenate([hp[k:k + T, :] for k in range(KW)],
                                     axis=-1))              # (T, KW*D)
    return jnp.concatenate(slabs, axis=0).astype(jnp.bfloat16)   # (B*T, KW*D)


def tts_kernel(tok_ref, emb_ref, wconv_ref, bconv_ref, wproj_ref, bproj_ref,
               out_ref):
    """Single grid step over the whole (tiny) batch.

    tok_ref  : (B*T, 1)  int32      flattened phoneme ids
    emb_ref  : (VOCAB, D) bf16      embedding table
    wconv_ref: (N_LAYERS, KW*D, D) bf16  im2col conv weights with BN folded in
    bconv_ref: (N_LAYERS, 1, D) f32      folded conv-bias + BN shift
    wproj_ref: (D, OUT_PAD) bf16         mel projection, zero-padded to 128 lanes
    bproj_ref: (1, OUT_PAD) f32
    out_ref  : (B*T, OUT_PAD) f32        lane-dense mel output
    """
    # In-kernel embedding gather: one-hot (B*T, VOCAB) @ table on the MXU.
    tok = tok_ref[...]                                              # (B*T, 1)
    eq = jax.lax.broadcasted_iota(jnp.int32, (BT, VOCAB), 1) == tok
    onehot = jnp.where(eq, 1.0, 0.0).astype(jnp.bfloat16)           # (B*T, VOCAB)
    h = jnp.dot(onehot, emb_ref[...],
                preferred_element_type=jnp.float32)                 # (B*T, D) f32

    # 3 x [Conv1d(k=5,'same') + folded eval-BN + ReLU], one matmul per layer.
    for layer in range(N_LAYERS):
        slab = _im2col(h)                                           # (B*T, KW*D) bf16
        acc = jnp.dot(slab, wconv_ref[layer],
                      preferred_element_type=jnp.float32)           # (B*T, D) f32
        h = jnp.maximum(acc + bconv_ref[layer], 0.0)

    # Mel projection (stand-in for decoder+postnet output); single full-lane store.
    out_ref[...] = (jnp.dot(h.astype(jnp.bfloat16), wproj_ref[...],
                            preferred_element_type=jnp.float32)
                    + bproj_ref[...])


def tts_encoder_pallas(tok, emb, wconv, bconv, wproj, bproj):
    """tok: (B*T, 1) int32 -> lane-dense mel (B*T, OUT_PAD) float32."""
    return pl.pallas_call(
        tts_kernel,
        out_shape=jax.ShapeDtypeStruct((BT, OUT_PAD), jnp.float32),
        grid=(1,),
        in_specs=[
            pl.BlockSpec((BT, 1), lambda i: (0, 0)),
            pl.BlockSpec((VOCAB, D), lambda i: (0, 0)),
            pl.BlockSpec((N_LAYERS, KW * D, D), lambda i: (0, 0, 0)),
            pl.BlockSpec((N_LAYERS, 1, D), lambda i: (0, 0, 0)),
            pl.BlockSpec((D, OUT_PAD), lambda i: (0, 0)),
            pl.BlockSpec((1, OUT_PAD), lambda i: (0, 0)),
        ],
        out_specs=pl.BlockSpec((BT, OUT_PAD), lambda i: (0, 0)),
        compiler_params=pltpu.CompilerParams(
            dimension_semantics=("arbitrary",)),
    )(tok, emb, wconv, bconv, wproj, bproj)


class TTSModelPallas:
    """Mirrors TTSModel: forward() returns '', get_spec() runs the kernel path."""

    def __init__(self, key):
        ks = jax.random.split(key, 8)
        # deterministic synthetic parameters (Tacotron2 encoder shapes, scaled down)
        emb = jax.random.normal(ks[0], (VOCAB, D), jnp.float32) * 0.1
        wconv = jax.random.normal(ks[1], (N_LAYERS, KW, D, D), jnp.float32) * 0.05
        bconv = jax.random.normal(ks[2], (N_LAYERS, 1, D), jnp.float32) * 0.01
        # eval-mode batch-norm params
        gamma = 1.0 + 0.1 * jax.random.normal(ks[3], (N_LAYERS, 1, D), jnp.float32)
        beta = 0.1 * jax.random.normal(ks[4], (N_LAYERS, 1, D), jnp.float32)
        run_mean = 0.01 * jax.random.normal(ks[5], (N_LAYERS, 1, D), jnp.float32)
        run_var = jnp.abs(1.0 + 0.1 * jax.random.normal(ks[6], (N_LAYERS, 1, D),
                                                        jnp.float32))
        eps = 1e-5
        bn_scale = gamma / jnp.sqrt(run_var + eps)          # (L, 1, D_out)
        bn_shift = beta - run_mean * bn_scale

        # One-time init transform: fold eval-BN into the conv weights/bias and
        # reshape the taps into im2col layout (KW*D_in, D_out), tap-major rows.
        wconv_folded = wconv * bn_scale[:, :, None, :]      # scale output channels
        self.wconv = wconv_folded.reshape(N_LAYERS, KW * D, D).astype(jnp.bfloat16)
        self.bconv = (bn_scale * bconv + bn_shift).astype(jnp.float32)   # (L,1,D)
        self.emb = emb.astype(jnp.bfloat16)

        # Mel projection, zero-padded to a lane-dense 128-wide output slab.
        wproj = jax.random.normal(ks[7], (D, N_MELS), jnp.float32) * 0.05
        self.wproj = (jnp.zeros((D, OUT_PAD), jnp.float32)
                      .at[:, :N_MELS].set(wproj)).astype(jnp.bfloat16)
        self.bproj = jnp.zeros((1, OUT_PAD), jnp.float32)

    def forward(self):
        # exact semantics of TTSModel.forward()
        return ''

    def get_spec(self, tokens):
        """tokens: (B, T) int32 phoneme ids -> spec (B, N_MELS, T)."""
        tok = tokens.reshape(BT, 1).astype(jnp.int32)
        mel = tts_encoder_pallas(tok, self.emb, self.wconv, self.bconv,
                                 self.wproj, self.bproj)      # (B*T, OUT_PAD)
        mel = mel.reshape(B, T, OUT_PAD)[:, :, :N_MELS]        # drop lane padding
        # PyTorch Tacotron2 returns spec as (B, n_mels, time)
        return jnp.transpose(mel, (0, 2, 1))
        # TODO(synk): attention decoder + WaveRNN vocoder (waveform synthesis)
        # are autoregressive sampling loops, not implemented as Pallas kernels.


if __name__ == "__main__":
    key = jax.random.PRNGKey(0)
    model = TTSModelPallas(key)

    # forward() semantics check
    assert model.forward() == ''

    # deterministic synthetic phoneme ids for text like 'Si'
    tok_key = jax.random.PRNGKey(0)
    tokens = jax.random.randint(tok_key, (B, T), 0, VOCAB, dtype=jnp.int32)

    spec = model.get_spec(tokens)
    spec = jax.block_until_ready(spec)
    assert spec.shape == (B, N_MELS, T)
    assert spec.dtype == jnp.float32
    print("KERNEL_OK")
</pallas_src>

<mosaic_0001>
module attributes {stable_mosaic.version = 11 : i64} {
  func.func @tts_kernel(%arg0: i32, %arg1: memref<16x1xi32, #tpu.memory_space<vmem>>, %arg2: memref<38x32xbf16, #tpu.memory_space<vmem>>, %arg3: memref<3x160x32xbf16, #tpu.memory_space<vmem>>, %arg4: memref<3x1x32xf32, #tpu.memory_space<vmem>>, %arg5: memref<32x128xbf16, #tpu.memory_space<vmem>>, %arg6: memref<1x128xf32, #tpu.memory_space<vmem>>, %arg7: memref<16x128xf32, #tpu.memory_space<vmem>>) attributes {dimension_semantics = [#tpu.dimension_semantics<arbitrary>], iteration_bounds = array<i64: 1>, scalar_prefetch = 0 : i64, scratch_operands = 0 : i64, tpu.core_type = #tpu.core_type<tc>, window_params = [{pipeline_mode = #tpu.pipeline_mode<synchronous>, transform_indices = @transform_0, window_bounds = array<i64: 16, 1>}, {pipeline_mode = #tpu.pipeline_mode<synchronous>, transform_indices = @transform_1, window_bounds = array<i64: 38, 32>}, {pipeline_mode = #tpu.pipeline_mode<synchronous>, transform_indices = @transform_2, window_bounds = array<i64: 3, 160, 32>}, {pipeline_mode = #tpu.pipeline_mode<synchronous>, transform_indices = @transform_3, window_bounds = array<i64: 3, 1, 32>}, {pipeline_mode = #tpu.pipeline_mode<synchronous>, transform_indices = @transform_4, window_bounds = array<i64: 32, 128>}, {pipeline_mode = #tpu.pipeline_mode<synchronous>, transform_indices = @transform_5, window_bounds = array<i64: 1, 128>}, {pipeline_mode = #tpu.pipeline_mode<synchronous>, transform_indices = @transform_6, window_bounds = array<i64: 16, 128>}]} {
    %c0 = arith.constant 0 : index
    %c0_0 = arith.constant 0 : index
    %0 = vector.load %arg1[%c0, %c0_0] : memref<16x1xi32, #tpu.memory_space<vmem>>, vector<16x1xi32>
    %1 = tpu.iota {dimensions = array<i32: 1>} : vector<16x38xi32>
    %2 = vector.broadcast %0 : vector<16x1xi32> to vector<16x38xi32>
    %3 = arith.cmpi eq, %1, %2 : vector<16x38xi32>
    %cst = arith.constant 1.000000e+00 : f32
    %cst_1 = arith.constant 0.000000e+00 : f32
    %4 = vector.broadcast %cst : f32 to vector<16x38xf32>
    %5 = vector.broadcast %cst_1 : f32 to vector<16x38xf32>
    %6 = arith.select %3, %4, %5 : vector<16x38xi1>, vector<16x38xf32>
    %7 = arith.truncf %6 : vector<16x38xf32> to vector<16x38xbf16>
    %c0_2 = arith.constant 0 : index
    %c0_3 = arith.constant 0 : index
    %8 = vector.load %arg2[%c0_2, %c0_3] : memref<38x32xbf16, #tpu.memory_space<vmem>>, vector<38x32xbf16>
    %cst_4 = arith.constant dense<0.000000e+00> : vector<16x32xf32>
    %9 = tpu.matmul %7, %8, %cst_4 {dimension_numbers = #tpu.dot_dimension_numbers<[1], [0], [0], [1], [0, 0, 1, 1], [], []>} : vector<16x38xbf16>, vector<38x32xbf16>, vector<16x32xf32> -> vector<16x32xf32>
    %cst_5 = arith.constant 0.000000e+00 : f32
    %10 = vector.broadcast %cst_5 : f32 to vector<2x32xf32>
    %11 = vector.extract_strided_slice %9 {offsets = [0, 0], sizes = [8, 32], strides = [1, 1]} : vector<16x32xf32> to vector<8x32xf32>
    %12 = tpu.concatenate %10, %11, %10 in 0 : vector<2x32xf32>, vector<8x32xf32>, vector<2x32xf32> -> vector<12x32xf32>
    %13 = vector.extract_strided_slice %12 {offsets = [0, 0], sizes = [8, 32], strides = [1, 1]} : vector<12x32xf32> to vector<8x32xf32>
    %14 = vector.extract_strided_slice %12 {offsets = [1, 0], sizes = [8, 32], strides = [1, 1]} : vector<12x32xf32> to vector<8x32xf32>
    %15 = vector.extract_strided_slice %12 {offsets = [2, 0], sizes = [8, 32], strides = [1, 1]} : vector<12x32xf32> to vector<8x32xf32>
    %16 = vector.extract_strided_slice %12 {offsets = [3, 0], sizes = [8, 32], strides = [1, 1]} : vector<12x32xf32> to vector<8x32xf32>
    %17 = vector.extract_strided_slice %12 {offsets = [4, 0], sizes = [8, 32], strides = [1, 1]} : vector<12x32xf32> to vector<8x32xf32>
    %18 = tpu.concatenate %13, %14, %15, %16, %17 in 1 : vector<8x32xf32>, vector<8x32xf32>, vector<8x32xf32>, vector<8x32xf32>, vector<8x32xf32> -> vector<8x160xf32>
    %19 = vector.extract_strided_slice %9 {offsets = [8, 0], sizes = [8, 32], strides = [1, 1]} : vector<16x32xf32> to vector<8x32xf32>
    %20 = tpu.concatenate %10, %19, %10 in 0 : vector<2x32xf32>, vector<8x32xf32>, vector<2x32xf32> -> vector<12x32xf32>
    %21 = vector.extract_strided_slice %20 {offsets = [0, 0], sizes = [8, 32], strides = [1, 1]} : vector<12x32xf32> to vector<8x32xf32>
    %22 = vector.extract_strided_slice %20 {offsets = [1, 0], sizes = [8, 32], strides = [1, 1]} : vector<12x32xf32> to vector<8x32xf32>
    %23 = vector.extract_strided_slice %20 {offsets = [2, 0], sizes = [8, 32], strides = [1, 1]} : vector<12x32xf32> to vector<8x32xf32>
    %24 = vector.extract_strided_slice %20 {offsets = [3, 0], sizes = [8, 32], strides = [1, 1]} : vector<12x32xf32> to vector<8x32xf32>
    %25 = vector.extract_strided_slice %20 {offsets = [4, 0], sizes = [8, 32], strides = [1, 1]} : vector<12x32xf32> to vector<8x32xf32>
    %26 = tpu.concatenate %21, %22, %23, %24, %25 in 1 : vector<8x32xf32>, vector<8x32xf32>, vector<8x32xf32>, vector<8x32xf32>, vector<8x32xf32> -> vector<8x160xf32>
    %27 = tpu.concatenate %18, %26 in 0 : vector<8x160xf32>, vector<8x160xf32> -> vector<16x160xf32>
    %28 = arith.truncf %27 : vector<16x160xf32> to vector<16x160xbf16>
    %c0_6 = arith.constant 0 : index
    %c0_7 = arith.constant 0 : index
    %c0_8 = arith.constant 0 : index
    %29 = vector.load %arg3[%c0_6, %c0_7, %c0_8] : memref<3x160x32xbf16, #tpu.memory_space<vmem>>, vector<1x160x32xbf16>
    %30 = vector.shape_cast %29 : vector<1x160x32xbf16> to vector<160x32xbf16>
    %cst_9 = arith.constant dense<0.000000e+00> : vector<16x32xf32>
    %31 = tpu.matmul %28, %30, %cst_9 {dimension_numbers = #tpu.dot_dimension_numbers<[1], [0], [0], [1], [0, 0, 1, 1], [], []>} : vector<16x160xbf16>, vector<160x32xbf16>, vector<16x32xf32> -> vector<16x32xf32>
    %c0_10 = arith.constant 0 : index
    %c0_11 = arith.constant 0 : index
    %c0_12 = arith.constant 0 : index
    %32 = vector.load %arg4[%c0_10, %c0_11, %c0_12] : memref<3x1x32xf32, #tpu.memory_space<vmem>>, vector<1x1x32xf32>
    %33 = vector.shape_cast %32 : vector<1x1x32xf32> to vector<1x32xf32>
    %34 = vector.broadcast %33 : vector<1x32xf32> to vector<16x32xf32>
    %35 = arith.addf %31, %34 : vector<16x32xf32>
    %cst_13 = arith.constant 0.000000e+00 : f32
    %36 = vector.broadcast %cst_13 : f32 to vector<16x32xf32>
    %37 = arith.maximumf %35, %36 : vector<16x32xf32>
    %cst_14 = arith.constant 0.000000e+00 : f32
    %38 = vector.broadcast %cst_14 : f32 to vector<2x32xf32>
    %39 = vector.extract_strided_slice %37 {offsets = [0, 0], sizes = [8, 32], strides = [1, 1]} : vector<16x32xf32> to vector<8x32xf32>
    %40 = tpu.concatenate %38, %39, %38 in 0 : vector<2x32xf32>, vector<8x32xf32>, vector<2x32xf32> -> vector<12x32xf32>
    %41 = vector.extract_strided_slice %40 {offsets = [0, 0], sizes = [8, 32], strides = [1, 1]} : vector<12x32xf32> to vector<8x32xf32>
    %42 = vector.extract_strided_slice %40 {offsets = [1, 0], sizes = [8, 32], strides = [1, 1]} : vector<12x32xf32> to vector<8x32xf32>
    %43 = vector.extract_strided_slice %40 {offsets = [2, 0], sizes = [8, 32], strides = [1, 1]} : vector<12x32xf32> to vector<8x32xf32>
    %44 = vector.extract_strided_slice %40 {offsets = [3, 0], sizes = [8, 32], strides = [1, 1]} : vector<12x32xf32> to vector<8x32xf32>
    %45 = vector.extract_strided_slice %40 {offsets = [4, 0], sizes = [8, 32], strides = [1, 1]} : vector<12x32xf32> to vector<8x32xf32>
    %46 = tpu.concatenate %41, %42, %43, %44, %45 in 1 : vector<8x32xf32>, vector<8x32xf32>, vector<8x32xf32>, vector<8x32xf32>, vector<8x32xf32> -> vector<8x160xf32>
    %47 = vector.extract_strided_slice %37 {offsets = [8, 0], sizes = [8, 32], strides = [1, 1]} : vector<16x32xf32> to vector<8x32xf32>
    %48 = tpu.concatenate %38, %47, %38 in 0 : vector<2x32xf32>, vector<8x32xf32>, vector<2x32xf32> -> vector<12x32xf32>
    %49 = vector.extract_strided_slice %48 {offsets = [0, 0], sizes = [8, 32], strides = [1, 1]} : vector<12x32xf32> to vector<8x32xf32>
    %50 = vector.extract_strided_slice %48 {offsets = [1, 0], sizes = [8, 32], strides = [1, 1]} : vector<12x32xf32> to vector<8x32xf32>
    %51 = vector.extract_strided_slice %48 {offsets = [2, 0], sizes = [8, 32], strides = [1, 1]} : vector<12x32xf32> to vector<8x32xf32>
    %52 = vector.extract_strided_slice %48 {offsets = [3, 0], sizes = [8, 32], strides = [1, 1]} : vector<12x32xf32> to vector<8x32xf32>
    %53 = vector.extract_strided_slice %48 {offsets = [4, 0], sizes = [8, 32], strides = [1, 1]} : vector<12x32xf32> to vector<8x32xf32>
    %54 = tpu.concatenate %49, %50, %51, %52, %53 in 1 : vector<8x32xf32>, vector<8x32xf32>, vector<8x32xf32>, vector<8x32xf32>, vector<8x32xf32> -> vector<8x160xf32>
    %55 = tpu.concatenate %46, %54 in 0 : vector<8x160xf32>, vector<8x160xf32> -> vector<16x160xf32>
    %56 = arith.truncf %55 : vector<16x160xf32> to vector<16x160xbf16>
    %c1 = arith.constant 1 : index
    %c0_15 = arith.constant 0 : index
    %c0_16 = arith.constant 0 : index
    %57 = vector.load %arg3[%c1, %c0_15, %c0_16] : memref<3x160x32xbf16, #tpu.memory_space<vmem>>, vector<1x160x32xbf16>
    %58 = vector.shape_cast %57 : vector<1x160x32xbf16> to vector<160x32xbf16>
    %cst_17 = arith.constant dense<0.000000e+00> : vector<16x32xf32>
    %59 = tpu.matmul %56, %58, %cst_17 {dimension_numbers = #tpu.dot_dimension_numbers<[1], [0], [0], [1], [0, 0, 1, 1], [], []>} : vector<16x160xbf16>, vector<160x32xbf16>, vector<16x32xf32> -> vector<16x32xf32>
    %c1_18 = arith.constant 1 : index
    %c0_19 = arith.constant 0 : index
    %c0_20 = arith.constant 0 : index
    %60 = vector.load %arg4[%c1_18, %c0_19, %c0_20] : memref<3x1x32xf32, #tpu.memory_space<vmem>>, vector<1x1x32xf32>
    %61 = vector.shape_cast %60 : vector<1x1x32xf32> to vector<1x32xf32>
    %62 = vector.broadcast %61 : vector<1x32xf32> to vector<16x32xf32>
    %63 = arith.addf %59, %62 : vector<16x32xf32>
    %cst_21 = arith.constant 0.000000e+00 : f32
    %64 = vector.broadcast %cst_21 : f32 to vector<16x32xf32>
    %65 = arith.maximumf %63, %64 : vector<16x32xf32>
    %cst_22 = arith.constant 0.000000e+00 : f32
    %66 = vector.broadcast %cst_22 : f32 to vector<2x32xf32>
    %67 = vector.extract_strided_slice %65 {offsets = [0, 0], sizes = [8, 32], strides = [1, 1]} : vector<16x32xf32> to vector<8x32xf32>
    %68 = tpu.concatenate %66, %67, %66 in 0 : vector<2x32xf32>, vector<8x32xf32>, vector<2x32xf32> -> vector<12x32xf32>
    %69 = vector.extract_strided_slice %68 {offsets = [0, 0], sizes = [8, 32], strides = [1, 1]} : vector<12x32xf32> to vector<8x32xf32>
    %70 = vector.extract_strided_slice %68 {offsets = [1, 0], sizes = [8, 32], strides = [1, 1]} : vector<12x32xf32> to vector<8x32xf32>
    %71 = vector.extract_strided_slice %68 {offsets = [2, 0], sizes = [8, 32], strides = [1, 1]} : vector<12x32xf32> to vector<8x32xf32>
    %72 = vector.extract_strided_slice %68 {offsets = [3, 0], sizes = [8, 32], strides = [1, 1]} : vector<12x32xf32> to vector<8x32xf32>
    %73 = vector.extract_strided_slice %68 {offsets = [4, 0], sizes = [8, 32], strides = [1, 1]} : vector<12x32xf32> to vector<8x32xf32>
    %74 = tpu.concatenate %69, %70, %71, %72, %73 in 1 : vector<8x32xf32>, vector<8x32xf32>, vector<8x32xf32>, vector<8x32xf32>, vector<8x32xf32> -> vector<8x160xf32>
    %75 = vector.extract_strided_slice %65 {offsets = [8, 0], sizes = [8, 32], strides = [1, 1]} : vector<16x32xf32> to vector<8x32xf32>
    %76 = tpu.concatenate %66, %75, %66 in 0 : vector<2x32xf32>, vector<8x32xf32>, vector<2x32xf32> -> vector<12x32xf32>
    %77 = vector.extract_strided_slice %76 {offsets = [0, 0], sizes = [8, 32], strides = [1, 1]} : vector<12x32xf32> to vector<8x32xf32>
    %78 = vector.extract_strided_slice %76 {offsets = [1, 0], sizes = [8, 32], strides = [1, 1]} : vector<12x32xf32> to vector<8x32xf32>
    %79 = vector.extract_strided_slice %76 {offsets = [2, 0], sizes = [8, 32], strides = [1, 1]} : vector<12x32xf32> to vector<8x32xf32>
    %80 = vector.extract_strided_slice %76 {offsets = [3, 0], sizes = [8, 32], strides = [1, 1]} : vector<12x32xf32> to vector<8x32xf32>
    %81 = vector.extract_strided_slice %76 {offsets = [4, 0], sizes = [8, 32], strides = [1, 1]} : vector<12x32xf32> to vector<8x32xf32>
    %82 = tpu.concatenate %77, %78, %79, %80, %81 in 1 : vector<8x32xf32>, vector<8x32xf32>, vector<8x32xf32>, vector<8x32xf32>, vector<8x32xf32> -> vector<8x160xf32>
    %83 = tpu.concatenate %74, %82 in 0 : vector<8x160xf32>, vector<8x160xf32> -> vector<16x160xf32>
    %84 = arith.truncf %83 : vector<16x160xf32> to vector<16x160xbf16>
    %c2 = arith.constant 2 : index
    %c0_23 = arith.constant 0 : index
    %c0_24 = arith.constant 0 : index
    %85 = vector.load %arg3[%c2, %c0_23, %c0_24] : memref<3x160x32xbf16, #tpu.memory_space<vmem>>, vector<1x160x32xbf16>
    %86 = vector.shape_cast %85 : vector<1x160x32xbf16> to vector<160x32xbf16>
    %cst_25 = arith.constant dense<0.000000e+00> : vector<16x32xf32>
    %87 = tpu.matmul %84, %86, %cst_25 {dimension_numbers = #tpu.dot_dimension_numbers<[1], [0], [0], [1], [0, 0, 1, 1], [], []>} : vector<16x160xbf16>, vector<160x32xbf16>, vector<16x32xf32> -> vector<16x32xf32>
    %c2_26 = arith.constant 2 : index
    %c0_27 = arith.constant 0 : index
    %c0_28 = arith.constant 0 : index
    %88 = vector.load %arg4[%c2_26, %c0_27, %c0_28] : memref<3x1x32xf32, #tpu.memory_space<vmem>>, vector<1x1x32xf32>
    %89 = vector.shape_cast %88 : vector<1x1x32xf32> to vector<1x32xf32>
    %90 = vector.broadcast %89 : vector<1x32xf32> to vector<16x32xf32>
    %91 = arith.addf %87, %90 : vector<16x32xf32>
    %cst_29 = arith.constant 0.000000e+00 : f32
    %92 = vector.broadcast %cst_29 : f32 to vector<16x32xf32>
    %93 = arith.maximumf %91, %92 : vector<16x32xf32>
    %94 = arith.truncf %93 : vector<16x32xf32> to vector<16x32xbf16>
    %c0_30 = arith.constant 0 : index
    %c0_31 = arith.constant 0 : index
    %95 = vector.load %arg5[%c0_30, %c0_31] : memref<32x128xbf16, #tpu.memory_space<vmem>>, vector<32x128xbf16>
    %cst_32 = arith.constant dense<0.000000e+00> : vector<16x128xf32>
    %96 = tpu.matmul %94, %95, %cst_32 {dimension_numbers = #tpu.dot_dimension_numbers<[1], [0], [0], [1], [0, 0, 1, 1], [], []>} : vector<16x32xbf16>, vector<32x128xbf16>, vector<16x128xf32> -> vector<16x128xf32>
    %c0_33 = arith.constant 0 : index
    %c0_34 = arith.constant 0 : index
    %97 = vector.load %arg6[%c0_33, %c0_34] : memref<1x128xf32, #tpu.memory_space<vmem>>, vector<1x128xf32>
    %98 = vector.broadcast %97 : vector<1x128xf32> to vector<16x128xf32>
    %99 = arith.addf %96, %98 : vector<16x128xf32>
    %c0_35 = arith.constant 0 : index
    %c0_36 = arith.constant 0 : index
    %100 = vector.load %arg7[%c0_35, %c0_36] : memref<16x128xf32, #tpu.memory_space<vmem>>, vector<16x128xf32>
    tpu.vector_store %arg7[%c0_35, %c0_36], %99 {strides = array<i32>} : memref<16x128xf32, #tpu.memory_space<vmem>>, vector<16x128xf32>,
    return
  }
  func.func @transform_0(%arg0: i32) -> (i32, i32) {
    %c0_i32 = arith.constant 0 : i32
    %c0_i32_0 = arith.constant 0 : i32
    %c0_i32_1 = arith.constant 0 : i32
    return %c0_i32, %c0_i32_0 : i32, i32
  }
  func.func @transform_1(%arg0: i32) -> (i32, i32) {
    %c0_i32 = arith.constant 0 : i32
    %c0_i32_0 = arith.constant 0 : i32
    %c0_i32_1 = arith.constant 0 : i32
    return %c0_i32, %c0_i32_0 : i32, i32
  }
  func.func @transform_2(%arg0: i32) -> (i32, i32, i32) {
    %c0_i32 = arith.constant 0 : i32
    %c0_i32_0 = arith.constant 0 : i32
    %c0_i32_1 = arith.constant 0 : i32
    %c0_i32_2 = arith.constant 0 : i32
    return %c0_i32, %c0_i32_0, %c0_i32_1 : i32, i32, i32
  }
  func.func @transform_3(%arg0: i32) -> (i32, i32, i32) {
    %c0_i32 = arith.constant 0 : i32
    %c0_i32_0 = arith.constant 0 : i32
    %c0_i32_1 = arith.constant 0 : i32
    %c0_i32_2 = arith.constant 0 : i32
    return %c0_i32, %c0_i32_0, %c0_i32_1 : i32, i32, i32
  }
  func.func @transform_4(%arg0: i32) -> (i32, i32) {
    %c0_i32 = arith.constant 0 : i32
    %c0_i32_0 = arith.constant 0 : i32
    %c0_i32_1 = arith.constant 0 : i32
    return %c0_i32, %c0_i32_0 : i32, i32
  }
  func.func @transform_5(%arg0: i32) -> (i32, i32) {
    %c0_i32 = arith.constant 0 : i32
    %c0_i32_0 = arith.constant 0 : i32
    %c0_i32_1 = arith.constant 0 : i32
    return %c0_i32, %c0_i32_0 : i32, i32
  }
  func.func @transform_6(%arg0: i32) -> (i32, i32) {
    %c0_i32 = arith.constant 0 : i32
    %c0_i32_0 = arith.constant 0 : i32
    %c0_i32_1 = arith.constant 0 : i32
    return %c0_i32, %c0_i32_0 : i32, i32
  }
}

</mosaic_0001>

<bundles_post_ra>
// kernel: tpu_custom_call.1
= control target key start
LH: loop header
LB: loop body
LE: loop exit
PB: predicated region body
PF: predicated region fallthrough
CT: control target
= control target key end

     0   :  { %v1029_v1 = vmov 0   ;;  %v1030_v3 = vmov 0.0   ;;  %vm64_vm0 = vcmask 1042432   ;;  %vm1031_vm1 = vmmov 0   ;;  %s1317_s0 = inlined_call_operand.vmem [shape: s32[16,1], index: 0, kind: input, shape index: {}]   ;;  %s1318_s1 = inlined_call_operand.vmem [shape: bf16[38,32], index: 1, kind: input, shape index: {}]   ;;  %s1319_s2 = inlined_call_operand.vmem [shape: bf16[3,160,32], index: 2, kind: input, shape index: {}]   ;;  %s1320_s3 = inlined_call_operand.vmem [shape: f32[3,1,32], index: 3, kind: input, shape index: {}]   ;;  %s1321_s4 = inlined_call_operand.vmem [shape: bf16[32,128], index: 4, kind: input, shape index: {}]   ;;  %s1322_s5 = inlined_call_operand.vmem [shape: f32[1,128], index: 5, kind: input, shape index: {}]   ;;  %s1323_s6 = inlined_call_operand.hbm [shape: f32[16,128], index: 6, kind: output, shape index: {}]  }
   0x1   :  { %v25_v0 = vld [vmem:[%s1317_s0] sm:$0xff]  ;;  %924 = vset.pattern.permute.xlu0 %v1029_v1  ;;  %v26_v2 = vld [vmem:[%s1317_s0 + $0x8] sm:$0xff]  ;;  %897 = vmatprep.subr.bf16.mxu0 %v1030_v3  ;;  %v972_v6 = vld [vmem:[%s1318_s1 + $0x10] ss:$0 sps:$4 sm:$0x77]  }
   0x2   :  { %v970_v4 = vld [vmem:[%s1318_s1] sm:$0xff]   ;;  %30 = vperm.xlu0 %924, %v25_v0   ;;  %v971_v5 = vld [vmem:[%s1318_s1 + $0x8] sm:$0xff]   ;;  %273 = vmatprep.subr.bf16.mxu1 %v1029_v1  ;;  %v66_v7 = vsel %vm64_vm0, %v972_v6, 0 }
   0x3   :  { %898 = vmatpush3.bf16.msra.mxu0 %v970_v4  ;;  %903 = vmatprep.mubr.msk.bf16.mxu0 %vm1031_vm1, %v1030_v3 }
   0x4   :  { %899 = vmatprep.subr.bf16.mxu0 %v1030_v3 }
   0x6   :  { %33 = vperm.xlu0 %924, %v26_v2  }
   0x7   :  { %900 = vmatpush3.bf16.msra.mxu0 %v971_v5 }
   0x8   :  { %901 = vmatprep.subr.bf16.mxu0 %v1030_v3 }
   0xb   :  { %902 = vmatpush3.bf16.msra.mxu0 %v66_v7 }
   0xc   :  { %474 = vmatprep.subr.bf16.mxu0 %v1029_v1 }
   0xd   :  { %11 = vsyncpa [#allocation3], 0  ;;  %v27_v8 = vlaneseq  ;;  %vm60_vm4 = vcmask 310272   ;;  %v973_v15 = vld [vmem:[%s1319_s2] sm:$0xff]   ;;  %v974_v16 = vld [vmem:[%s1319_s2 + $0x8] sm:$0xff]   ;;  %vm112_vm5 = vcmask 1041408  }
   0xe   :  { %274 = vmatpush1.bf16.msra.mxu1 %v973_v15  ;;  %v975_v17 = vld [vmem:[%s1319_s2 + $0x10] sm:$0xff]   ;;  %v976_v18 = vld [vmem:[%s1319_s2 + $0x18] sm:$0xff]   ;;  %v977_v19 = vld [vmem:[%s1319_s2 + $0x20] sm:$0xff]   ;;  %vm138_vm6 = vcmask 1043456   ;;  %vm143_vm7 = vcmask 261120   ;;  %vm131_vm8 = vcmask 1044480  }
   0xf   :  { %v28_v9 = vand.u32 127, %v27_v8  ;;  %275 = vmatprep.subr.bf16.mxu1 %v1029_v1  ;;  %v978_v20 = vld [vmem:[%s1319_s2 + $0x28] sm:$0xff]   ;;  %v979_v21 = vld [vmem:[%s1319_s2 + $0x30] sm:$0xff]   ;;  %v980_v22 = vld [vmem:[%s1319_s2 + $0x38] sm:$0xff]   ;;  %vm117_vm9 = vcmask 1046528   ;;  %vm124_vm10 = vcmask 1045504  }
  0x10   :  { %v981_v27 = vld [vmem:[%s1319_s2 + $0x40] sm:$0xff]   ;;  %v982_v44 = vld [vmem:[%s1319_s2 + $0x48] sm:$0xff]   ;;  %s1032_s25 = smov 96   ;;  %s1033_s26 = smov 32   ;;  %vm145_vm11 = vcmask 523264   ;;  %vm147_vm12 = vcmask 785408  }
  0x11   :  { %s1034_s27 = smov 64  }
  0x12   :  { %276 = vmatpush1.bf16.msra.mxu1 %v974_v16 }
  0x13   :  { %277 = vmatprep.subr.bf16.mxu1 %v1029_v1 }
  0x16   :  { %278 = vmatpush1.bf16.msra.mxu1 %v975_v17  ;;  %v983_v17 = vld [vmem:[%s1319_s2 + $0x50] sm:$0xff]  }
  0x17   :  { %279 = vmatprep.subr.bf16.mxu1 %v1029_v1 }
  0x1a   :  { %280 = vmatpush1.bf16.msra.mxu1 %v976_v18  ;;  %v984_v18 = vld [vmem:[%s1319_s2 + $0x58] sm:$0xff]  }
  0x1b   :  { %281 = vmatprep.subr.bf16.mxu1 %v1029_v1 }
  0x1e   :  { %282 = vmatpush1.bf16.msra.mxu1 %v977_v19  ;;  %v985_v19 = vld [vmem:[%s1319_s2 + $0x60] sm:$0xff]  }
  0x1f   :  { %283 = vmatprep.subr.bf16.mxu1 %v1029_v1 }
  0x22   :  { %284 = vmatpush1.bf16.msra.mxu1 %v978_v20  ;;  %v986_v20 = vld [vmem:[%s1319_s2 + $0x68] sm:$0xff]  }
  0x23   :  { %285 = vmatprep.subr.bf16.mxu1 %v1029_v1 }
  0x26   :  { %286 = vmatpush1.bf16.msra.mxu1 %v979_v21  ;;  %v987_v21 = vld [vmem:[%s1319_s2 + $0x70] sm:$0xff]  }
  0x27   :  { %287 = vmatprep.subr.bf16.mxu1 %v1029_v1 }
  0x2a   :  { %288 = vmatpush1.bf16.msra.mxu1 %v980_v22  ;;  %v988_v22 = vld [vmem:[%s1319_s2 + $0x78] sm:$0xff]  }
  0x2b   :  { %289 = vmatprep.subr.bf16.mxu1 %v1029_v1 }
  0x2e   :  { %290 = vmatpush1.bf16.msra.mxu1 %v981_v27 }
  0x2f   :  { %291 = vmatprep.subr.bf16.mxu1 %v1029_v1 }
  0x32   :  { %292 = vmatpush1.bf16.msra.mxu1 %v982_v44 }
  0x33   :  { %675 = vmatprep.subr.bf16.mxu1 %v1029_v1 }
  0x81   :  { %v31_v10 = vpop.permute.xlu0 %30 }
  0x82   :  { %vm35_vm2 = vcmp.eq.s32.totalorder %v28_v9, %v31_v10 }
  0x83   :  { %v37_v12 = vsel %vm35_vm2, 1.0, %v1030_v3 }
  0x85   :  { %v34_v11 = vpop.permute.xlu0 %33 }
  0x86   :  { %vm36_vm3 = vcmp.eq.s32.totalorder %v28_v9, %v34_v11 }
  0x87   :  { %v38_v13 = vsel %vm36_vm3, 1.0, %v1030_v3 }
  0x88   :  { %v39_v14 = vpack.c.bf16 %v38_v13, %v37_v12 }
  0x8a   :  { %904 = vmatmul.mubr.msk.bf16.vlgmr.msra.gmra.mrb[0].mxu0 %vm60_vm4, %v39_v14 }
  0x8b   :  { %475 = vmatpush1.bf16.msra.mxu0 %v983_v17 }
  0x8c   :  { %476 = vmatprep.subr.bf16.mxu0 %v1029_v1 }
  0x8f   :  { %477 = vmatpush1.bf16.msra.mxu0 %v984_v18 }
  0x90   :  { %478 = vmatprep.subr.bf16.mxu0 %v1029_v1 }
  0x93   :  { %479 = vmatpush1.bf16.msra.mxu0 %v985_v19 }
  0x94   :  { %480 = vmatprep.subr.bf16.mxu0 %v1029_v1 }
  0x97   :  { %481 = vmatpush1.bf16.msra.mxu0 %v986_v20 }
  0x98   :  { %482 = vmatprep.subr.bf16.mxu0 %v1029_v1 }
  0x9b   :  { %483 = vmatpush1.bf16.msra.mxu0 %v987_v21 }
  0x9c   :  { %484 = vmatprep.subr.bf16.mxu0 %v1029_v1 }
  0x9f   :  { %485 = vmatpush1.bf16.msra.mxu0 %v988_v22 }
  0xa0   :  { %486 = vmatprep.subr.bf16.mxu0 %v1029_v1 }
 0x15d   :  { %v102_v23 = vpop.f32.mrb[0].mxu0 }
 0x15e   :  { %v110_v24 = vrot.slane %v102_v23, 6  ;;  %v905_v25 = vpop.f32.mrb[1].mxu0  ;;  %v989_v23 = vld [vmem:[%s1319_s2 + $0x80] sm:$0xff]  }
 0x15f   :  { %v105_v26 = vpop.f32.mrb[2].mxu0  ;;  %487 = vmatpush1.bf16.msra.mxu0 %v989_v23  ;;  %v808_v25 = vld [vmem:[%s1320_s3] ss:$0 sm:$0xff] }
 0x160   :  { %v113_v28 = vsel %vm112_vm5, 0.0, %v110_v24  ;;  %v114_v29 = vsel %vm112_vm5, %v110_v24, 0.0  ;;  %v150_v30 = vrot.slane %v105_v26, 6  ;;  %v906_v31 = vpop.f32.mrb[3].mxu0  ;;  %v990_v24 = vld [vmem:[%s1319_s2 + $0x88] sm:$0xff]   ;;  %488 = vmatprep.subr.bf16.mxu0 %v1029_v1 }
 0x161   :  { %v119_v32 = vrot.slane %v114_v29, 1  ;;  %v125_v33 = vrot.slane %v113_v28, 2  ;;  %v126_v34 = vrot.slane %v114_v29, 2  ;;  %v132_v35 = vrot.slane %v113_v28, 3 }
 0x162   :  { %v133_v36 = vrot.slane %v114_v29, 3  ;;  %v140_v37 = vrot.slane %v114_v29, 4  ;;  %v152_v38 = vsel %vm112_vm5, 0.0, %v150_v30  ;;  %v153_v39 = vsel %vm112_vm5, %v150_v30, 0.0 }
 0x163   :  { %v157_v40 = vrot.slane %v153_v39, 1  ;;  %v162_v41 = vrot.slane %v152_v38, 2  ;;  %v163_v42 = vrot.slane %v153_v39, 2  ;;  %v168_v43 = vrot.slane %v152_v38, 3  ;;  %489 = vmatpush1.bf16.msra.mxu0 %v990_v24  ;;  %v993_v24 = vld [vmem:[%s1319_s2 + $0xa0] sm:$0xff]  }
 0x164   :  { %v169_v45 = vrot.slane %v153_v39, 3  ;;  %v175_v46 = vrot.slane %v153_v39, 4  ;;  %v139_v47 = vrot.slane %v113_v28, 4  ;;  %v174_v48 = vrot.slane %v152_v38, 4  ;;  %490 = vmatprep.subr.bf16.mxu0 %v1029_v1 }
 0x165   :  { %v134_v49 = vsel %vm131_vm8, %v132_v35, %v133_v36  ;;  %v118_v50 = vrot.slane %v113_v28, 1  ;;  %v156_v51 = vrot.slane %v152_v38, 1  ;;  %v127_v52 = vsel %vm124_vm10, %v125_v33, %v126_v34  ;;  %v991_v35 = vld [vmem:[%s1319_s2 + $0x90] sm:$0xff]  }
 0x166   :  { %v141_v53 = vsel %vm138_vm6, %v139_v47, %v140_v37  ;;  %v176_v54 = vsel %vm138_vm6, %v174_v48, %v175_v46  ;;  %v170_v55 = vsel %vm131_vm8, %v168_v43, %v169_v45  ;;  %v164_v56 = vsel %vm124_vm10, %v162_v41, %v163_v42 }
 0x167   :  { %v182_v57 = vpack.c.bf16 %v176_v54, %v141_v53  ;;  %v935_v58 = vpack.i.bf16 %v170_v55, %v134_v49  ;;  %v120_v59 = vsel %vm117_vm9, %v118_v50, %v119_v32  ;;  %v158_v60 = vsel %vm117_vm9, %v156_v51, %v157_v40  ;;  %491 = vmatpush1.bf16.msra.mxu0 %v991_v35  ;;  %v992_v53 = vld [vmem:[%s1319_s2 + $0x98] sm:$0xff]  }
 0x168   :  { %v925_v61 = vpack.i.bf16 %v158_v60, %v120_v59  ;;  %v930_v62 = vpack.i.bf16 %v164_v56, %v127_v52  ;;  %492 = vmatprep.subr.bf16.mxu0 %v1029_v1 }
 0x169   :  { %819 = vmatprep.mubr.msk.bf16.mxu1 %vm143_vm7, %v182_v57  ;;  %936 = vrot.lane.b32.xlu0 %v935_v58, %s1032_s25 }
 0x16a   :  { %926 = vrot.lane.b32.xlu1 %v925_v61, %s1033_s26 }
 0x16b   :  { %493 = vmatpush1.bf16.msra.mxu0 %v992_v53 }
 0x16c   :  { %907 = vmatprep.subr.bf16.mxu0 %v1030_v3 }
 0x16e   :  { %931 = vrot.lane.b32.xlu1 %v930_v62, %s1034_s27 }
 0x1db   :  { %v937_v4 = vpop.permute.xlu0 %936 }
 0x1dc   :  { %v927_v63 = vpop.permute.xlu1 %926  ;;  %v939_v8 = vunpack.i.h.bf16 %v937_v4  ;;  %v938_v9 = vunpack.i.l.bf16 %v937_v4 }
 0x1dd   :  { %v929_v0 = vunpack.i.h.bf16 %v927_v63  ;;  %v928_v2 = vunpack.i.l.bf16 %v927_v63 }
 0x1df   :  { %v178_v10 = vsel %vm143_vm7, %v152_v38, %v929_v0  ;;  %v144_v11 = vsel %vm143_vm7, %v113_v28, %v928_v2 }
 0x1e0   :  { %v932_v5 = vpop.permute.xlu1 %931 }
 0x1e1   :  { %v934_v6 = vunpack.i.h.bf16 %v932_v5  ;;  %v933_v7 = vunpack.i.l.bf16 %v932_v5 }
 0x1e3   :  { %v146_v12 = vsel %vm145_vm11, %v144_v11, %v933_v7  ;;  %v179_v13 = vsel %vm145_vm11, %v178_v10, %v934_v6 }
 0x1e4   :  { %v148_v14 = vsel %vm147_vm12, %v146_v12, %v938_v9  ;;  %v180_v15 = vsel %vm147_vm12, %v179_v13, %v939_v8 }
 0x1e5   :  { %v181_v16 = vpack.c.bf16 %v180_v15, %v148_v14 }
 0x1e7   :  { %306 = vmatmul.mubr.bf16.vlgmr.msra.gmra.mrb[0].mxu1 %v181_v16 }
 0x1e8   :  { %676 = vmatpush1.bf16.msra.mxu1 %v993_v24 }
 0x1e9   :  { %677 = vmatprep.subr.bf16.mxu1 %v1029_v1 }
 0x2ba   :  { %v307_v26 = vpop.f32.mrb[0].mxu1 }
 0x2bb   :  { %v308_v27 = vadd.f32 %v808_v25, %v307_v26  ;;  %v309_v28 = vpop.f32.mrb[1].mxu1  ;;  %v995_v26 = vld [vmem:[%s1319_s2 + $0xb0] sm:$0xff]  }
 0x2bc   :  { %v310_v29 = vpop.f32.mrb[2].mxu1  ;;  %v997_v28 = vld [vmem:[%s1319_s2 + $0xc0] sm:$0xff]  }
 0x2bd   :  { %v314_v30 = vmax.f32 %v308_v27, 0.0  ;;  %v311_v31 = vadd.f32 %v808_v25, %v310_v29  ;;  %v312_v32 = vpop.f32.mrb[3].mxu1  ;;  %v994_v25 = vld [vmem:[%s1319_s2 + $0xa8] sm:$0xff]   ;;  %v996_v27 = vld [vmem:[%s1319_s2 + $0xb8] sm:$0xff]  }
 0x2be   :  { %678 = vmatpush1.bf16.msra.mxu1 %v994_v25  ;;  %v998_v29 = vld [vmem:[%s1319_s2 + $0xc8] sm:$0xff]   ;;  %v841_v32 = vld [vmem:[%s1320_s3 + $0x1] ss:$0 sm:$0xff] }
 0x2bf   :  { %v317_v33 = vrot.slane %v314_v30, 6  ;;  %v315_v34 = vmax.f32 %v311_v31, 0.0  ;;  %679 = vmatprep.subr.bf16.mxu1 %v1029_v1  ;;  %v999_v30 = vld [vmem:[%s1319_s2 + $0xd0] sm:$0xff]   ;;  %v1000_v31 = vld [vmem:[%s1319_s2 + $0xd8] sm:$0xff]  }
 0x2c1   :  { %v319_v36 = vsel %vm112_vm5, 0.0, %v317_v33  ;;  %v320_v37 = vsel %vm112_vm5, %v317_v33, 0.0  ;;  %v349_v38 = vrot.slane %v315_v34, 6 }
 0x2c2   :  { %v330_v39 = vrot.slane %v320_v37, 2  ;;  %v341_v40 = vrot.slane %v319_v36, 4  ;;  %v342_v41 = vrot.slane %v320_v37, 4  ;;  %v329_v44 = vrot.slane %v319_v36, 2  ;;  %680 = vmatpush1.bf16.msra.mxu1 %v995_v26 }
 0x2c3   :  { %v351_v42 = vsel %vm112_vm5, 0.0, %v349_v38  ;;  %v352_v43 = vsel %vm112_vm5, %v349_v38, 0.0  ;;  %v324_v45 = vrot.slane %v320_v37, 1  ;;  %v336_v49 = vrot.slane %v320_v37, 3  ;;  %681 = vmatprep.subr.bf16.mxu1 %v1029_v1 }
 0x2c4   :  { %v356_v46 = vrot.slane %v352_v43, 1  ;;  %v362_v47 = vrot.slane %v352_v43, 2  ;;  %v373_v48 = vrot.slane %v351_v42, 4  ;;  %v368_v50 = vrot.slane %v352_v43, 3 }
 0x2c5   :  { %v374_v51 = vrot.slane %v352_v43, 4  ;;  %v361_v52 = vrot.slane %v351_v42, 2  ;;  %v323_v54 = vrot.slane %v319_v36, 1  ;;  %v355_v55 = vrot.slane %v351_v42, 1 }
 0x2c6   :  { %v335_v56 = vrot.slane %v319_v36, 3  ;;  %v367_v57 = vrot.slane %v351_v42, 3  ;;  %v343_v58 = vsel %vm138_vm6, %v341_v40, %v342_v41  ;;  %v331_v60 = vsel %vm124_vm10, %v329_v44, %v330_v39  ;;  %682 = vmatpush1.bf16.msra.mxu1 %v996_v27 }
 0x2c7   :  { %v375_v59 = vsel %vm138_vm6, %v373_v48, %v374_v51  ;;  %v363_v61 = vsel %vm124_vm10, %v361_v52, %v362_v47  ;;  %v325_v0 = vsel %vm117_vm9, %v323_v54, %v324_v45  ;;  %v357_v2 = vsel %vm117_vm9, %v355_v55, %v356_v46  ;;  %683 = vmatprep.subr.bf16.mxu1 %v1029_v1 }
 0x2c8   :  { %v381_v62 = vpack.c.bf16 %v375_v59, %v343_v58  ;;  %v945_v63 = vpack.i.bf16 %v363_v61, %v331_v60  ;;  %v940_v4 = vpack.i.bf16 %v357_v2, %v325_v0  ;;  %v337_v5 = vsel %vm131_vm8, %v335_v56, %v336_v49  ;;  %v1002_v60 = vld [vmem:[%s1319_s2 + $0xe8] sm:$0xff]  }
 0x2c9   :  { %v369_v6 = vsel %vm131_vm8, %v367_v57, %v368_v50 }
 0x2ca   :  { %852 = vmatprep.mubr.msk.bf16.mxu0 %vm143_vm7, %v381_v62  ;;  %946 = vrot.lane.b32.xlu0 %v945_v63, %s1034_s27  ;;  %v950_v7 = vpack.i.bf16 %v369_v6, %v337_v5 }
 0x2cb   :  { %941 = vrot.lane.b32.xlu1 %v940_v4, %s1033_s26  ;;  %684 = vmatpush1.bf16.msra.mxu1 %v997_v28 }
 0x2cc   :  { %685 = vmatprep.subr.bf16.mxu1 %v1029_v1 }
 0x2cf   :  { %951 = vrot.lane.b32.xlu1 %v950_v7, %s1032_s25  ;;  %686 = vmatpush1.bf16.msra.mxu1 %v998_v29 }
 0x2d0   :  { %687 = vmatprep.subr.bf16.mxu1 %v1029_v1 }
 0x2d3   :  { %688 = vmatpush1.bf16.msra.mxu1 %v999_v30  ;;  %v1003_v30 = vld [vmem:[%s1321_s4] sm:$0xff]  }
 0x2d4   :  { %689 = vmatprep.subr.bf16.mxu1 %v1029_v1 }
 0x2d7   :  { %690 = vmatpush1.bf16.msra.mxu1 %v1000_v31  ;;  %v1004_v31 = vld [vmem:[%s1321_s4 + $0x8] sm:$0xff]   ;;  %s1035_s4 = smov [#allocation2]  }
 0x2d8   :  { %691 = vmatprep.subr.bf16.mxu1 %v1029_v1  ;;  %s793_s30 = sshll.u32 %s1035_s4, 4  ;;  %s794_s30 = int_to_ptr.vmem [resolvable:$true] %s793_s30 }
 0x2d9   :  { %p1010_p1 = scmp.lt.s32.totalorder %s794_s30, %s794_s30 }
 0x33c   :  { %v947_v8 = vpop.permute.xlu0 %946 }
 0x33d   :  { %v942_v9 = vpop.permute.xlu1 %941  ;;  %v949_v12 = vunpack.i.h.bf16 %v947_v8  ;;  %v948_v13 = vunpack.i.l.bf16 %v947_v8 }
 0x33e   :  { %v944_v10 = vunpack.i.h.bf16 %v942_v9  ;;  %v943_v11 = vunpack.i.l.bf16 %v942_v9 }
 0x340   :  { %v377_v14 = vsel %vm143_vm7, %v351_v42, %v944_v10  ;;  %v345_v15 = vsel %vm143_vm7, %v319_v36, %v943_v11  ;;  %v1001_v42 = vld [vmem:[%s1319_s2 + $0xe0] sm:$0xff]  }
 0x341   :  { %v952_v16 = vpop.permute.xlu1 %951  ;;  %v346_v19 = vsel %vm145_vm11, %v345_v15, %v948_v13  ;;  %v378_v20 = vsel %vm145_vm11, %v377_v14, %v949_v12  ;;  %692 = vmatpush1.bf16.msra.mxu1 %v1001_v42 }
 0x342   :  { %v954_v17 = vunpack.i.h.bf16 %v952_v16  ;;  %v953_v18 = vunpack.i.l.bf16 %v952_v16  ;;  %693 = vmatprep.subr.bf16.mxu1 %v1029_v1 }
 0x344   :  { %v347_v21 = vsel %vm147_vm12, %v346_v19, %v953_v18  ;;  %v379_v22 = vsel %vm147_vm12, %v378_v20, %v954_v17 }
 0x345   :  { %v380_v23 = vpack.c.bf16 %v379_v22, %v347_v21  ;;  %694 = vmatpush1.bf16.msra.mxu1 %v1002_v60 }
 0x347   :  { %507 = vmatmul.mubr.bf16.vlgmr.msra.gmra.mrb[4].mxu0 %v380_v23 }
 0x348   :  { %911 = vmatprep.mubr.msk.bf16.mxu0 %vm1031_vm1, %v1030_v3  ;;  %908 = vmatpush3.bf16.msra.mxu0 %v1003_v30 }
 0x349   :  { %909 = vmatprep.subr.bf16.mxu0 %v1030_v3  ;;  %v886_v3 = vld [vmem:[%s1322_s5] ss:$0 sm:$0xff] }
 0x34c   :  { %910 = vmatpush3.bf16.msra.mxu0 %v1004_v31 }
 0x41a   :  { %v508_v33 = vpop.f32.mrb[4].mxu0 }
 0x41b   :  { %v509_v34 = vadd.f32 %v841_v32, %v508_v33  ;;  %v510_v35 = vpop.f32.mrb[5].mxu0 }
 0x41c   :  { %v511_v36 = vpop.f32.mrb[6].mxu0 }
 0x41d   :  { %v515_v37 = vmax.f32 %v509_v34, 0.0  ;;  %v512_v38 = vadd.f32 %v841_v32, %v511_v36  ;;  %v513_v39 = vpop.f32.mrb[7].mxu0  ;;  %v874_v32 = vld [vmem:[%s1320_s3 + $0x2] ss:$0 sm:$0xff]  ;;  %s1005_s3 = scalar_lea.vmem %s794_s30, 256 }
 0x41e   :  { %p1006_p0 = scmp.ne.s32.totalorder %s794_s30, %s1005_s3  ;;  %p1011_p2 = scmp.lt.s32.totalorder %s1005_s3, %s1005_s3 }
 0x41f   :  { %v518_v40 = vrot.slane %v515_v37, 6  ;;  %v516_v41 = vmax.f32 %v512_v38, 0.0 }
 0x420   :  { %p1012_p3 = por %p1011_p2, %p1010_p1 }
 0x421   :  { %v520_v43 = vsel %vm112_vm5, 0.0, %v518_v40  ;;  %v521_v44 = vsel %vm112_vm5, %v518_v40, 0.0  ;;  %v550_v45 = vrot.slane %v516_v41, 6 }
 0x422   :  { %v531_v46 = vrot.slane %v521_v44, 2  ;;  %v542_v47 = vrot.slane %v520_v43, 4  ;;  %v543_v48 = vrot.slane %v521_v44, 4  ;;  %v530_v51 = vrot.slane %v520_v43, 2  ;;  %p1013_p4 = pnand %p1012_p3, %p1006_p0 }
 0x423   :  { %v552_v49 = vsel %vm112_vm5, 0.0, %v550_v45  ;;  %v553_v50 = vsel %vm112_vm5, %v550_v45, 0.0  ;;  %v525_v52 = vrot.slane %v521_v44, 1  ;;  %v537_v56 = vrot.slane %v521_v44, 3 }
 0x424   :  { %v557_v53 = vrot.slane %v553_v50, 1  ;;  %v563_v54 = vrot.slane %v553_v50, 2  ;;  %v574_v55 = vrot.slane %v552_v49, 4  ;;  %v569_v57 = vrot.slane %v553_v50, 3 }
 0x425   :  { %v575_v58 = vrot.slane %v553_v50, 4  ;;  %v562_v59 = vrot.slane %v552_v49, 2  ;;  %v524_v61 = vrot.slane %v520_v43, 1  ;;  %v556_v62 = vrot.slane %v552_v49, 1 }
 0x426   :  { %v536_v63 = vrot.slane %v520_v43, 3  ;;  %v568_v0 = vrot.slane %v552_v49, 3  ;;  %v544_v2 = vsel %vm138_vm6, %v542_v47, %v543_v48  ;;  %v532_v4 = vsel %vm124_vm10, %v530_v51, %v531_v46 }
 0x427   :  { %v576_v1 = vsel %vm138_vm6, %v574_v55, %v575_v58  ;;  %v564_v5 = vsel %vm124_vm10, %v562_v59, %v563_v54  ;;  %v526_v8 = vsel %vm117_vm9, %v524_v61, %v525_v52  ;;  %v558_v9 = vsel %vm117_vm9, %v556_v62, %v557_v53 }
 0x428   :  { %v582_v6 = vpack.c.bf16 %v576_v1, %v544_v2  ;;  %v960_v7 = vpack.i.bf16 %v564_v5, %v532_v4  ;;  %v955_v10 = vpack.i.bf16 %v558_v9, %v526_v8  ;;  %v538_v11 = vsel %vm131_vm8, %v536_v63, %v537_v56 }
 0x429   :  { %v570_v12 = vsel %vm131_vm8, %v568_v0, %v569_v57 }
 0x42a   :  { %885 = vmatprep.mubr.msk.bf16.mxu1 %vm143_vm7, %v582_v6  ;;  %961 = vrot.lane.b32.xlu1 %v960_v7, %s1034_s27  ;;  %v965_v13 = vpack.i.bf16 %v570_v12, %v538_v11 }
 0x42b   :  { %956 = vrot.lane.b32.xlu0 %v955_v10, %s1033_s26 }
 0x42f   :  { %966 = vrot.lane.b32.xlu0 %v965_v13, %s1032_s25 }
 0x49c   :  { %v962_v14 = vpop.permute.xlu1 %961 }
 0x49d   :  { %v957_v15 = vpop.permute.xlu0 %956  ;;  %v964_v18 = vunpack.i.h.bf16 %v962_v14  ;;  %v963_v19 = vunpack.i.l.bf16 %v962_v14 }
 0x49e   :  { %v959_v16 = vunpack.i.h.bf16 %v957_v15  ;;  %v958_v17 = vunpack.i.l.bf16 %v957_v15 }
 0x4a0   :  { %v578_v20 = vsel %vm143_vm7, %v552_v49, %v959_v16  ;;  %v546_v21 = vsel %vm143_vm7, %v520_v43, %v958_v17 }
 0x4a1   :  { %v967_v22 = vpop.permute.xlu0 %966  ;;  %v547_v25 = vsel %vm145_vm11, %v546_v21, %v963_v19  ;;  %v579_v26 = vsel %vm145_vm11, %v578_v20, %v964_v18 }
 0x4a2   :  { %v969_v23 = vunpack.i.h.bf16 %v967_v22  ;;  %v968_v24 = vunpack.i.l.bf16 %v967_v22 }
 0x4a4   :  { %v548_v27 = vsel %vm147_vm12, %v547_v25, %v968_v24  ;;  %v580_v28 = vsel %vm147_vm12, %v579_v26, %v969_v23 }
 0x4a5   :  { %v581_v29 = vpack.c.bf16 %v580_v28, %v548_v27 }
 0x4a7   :  { %708 = vmatmul.mubr.bf16.vlgmr.msra.gmra.mrb[4].mxu1 %v581_v29 }
 0x57a   :  { %v709_v33 = vpop.f32.mrb[4].mxu1 }
 0x57b   :  { %v710_v34 = vadd.f32 %v874_v32, %v709_v33  ;;  %v711_v35 = vpop.f32.mrb[5].mxu1 }
 0x57c   :  { %v712_v36 = vpop.f32.mrb[6].mxu1 }
 0x57d   :  { %v713_v37 = vadd.f32 %v874_v32, %v712_v36  ;;  %v714_v38 = vpop.f32.mrb[7].mxu1  ;;  %v716_v39 = vmax.f32 %v710_v34, 0.0 }
 0x57f   :  { %v717_v40 = vmax.f32 %v713_v37, 0.0 }
 0x581   :  { %v718_v41 = vpack.c.bf16 %v717_v40, %v716_v39 }
 0x583   :  { %912 = vmatmul.mubr.msk.bf16.vlgmr.msra.gmra.mrb[8].mxu0 %vm143_vm7, %v718_v41 }
 0x656   :  { %v779_v42 = vpop.f32.mrb[8].mxu0 }
 0x657   :  { %v780_v43 = vadd.f32 %v886_v3, %v779_v42  ;;  %v913_v44 = vpop.f32.mrb[9].mxu0 }
 0x658   :  { %v782_v45 = vpop.f32.mrb[10].mxu0 }
 0x659   :  { %786 = vst [vmem:[#allocation2] sm:$0xff] %v780_v43  ;;  %v783_v46 = vadd.f32 %v886_v3, %v782_v45  ;;  %v914_v47 = vpop.f32.mrb[11].mxu0 }
 0x65b   :  { %787 = vst [vmem:[#allocation2 + $0x8] sm:$0xff] %v783_v46 }
 0x65c   :  { %1016 = shalt.err (!%p1013_p4)
}
 0x65d   :  { %s1017_s1 = scalar_lea.hbm %s1323_s6, 256 }
 0x65e   :  { %p1018_p5 = scmp.ne.s32.totalorder %s1323_s6, %s1017_s1  ;;  %p1021_p6 = scmp.lt.u32.totalorder %s1017_s1, %s1323_s6 }
 0x660   :  { %p1023_p7 = pnand %p1021_p6, %p1018_p5 }
 0x662   :  { %1026 = shalt.err (!%p1023_p7)
}
 0x663   :  { %s1036_s11 = smov 128   ;;  %s1037_s12 = smov 8  }
 0x664   :  { %799 = dma.vmem_to_hbm [thread:$0]  %s794_s30, 256, %s1323_s6, [#allocation3], %s1036_s11, %s1036_s11, %s1037_s12  }
 0x665   :  { %1027 = dma.done.wait [#allocation3], 256  }
 0x666   :  { %1028 = vsyncadd [#allocation3], 4294967040 }
 0x667   :  { %803 = vsyncpa [#allocation3], 1 }

</bundles_post_ra>
